<compile_context>
chip_gen: v7x
topology: tpu7x:2x2x1
jax: 0.10.0
libtpu: 0.0.40
codegen_flags: <defaults>
</compile_context>

<pallas_src>
import functools

import jax
import jax.numpy as jnp
from jax.experimental import pallas as pl
from jax.experimental.pallas import tpu as pltpu

BN_EPS = 1e-5
LANE = 128


def _round_up(n, m):
    return ((n + m - 1) // m) * m


def _compiler_params(sem, *byte_terms):
    """CompilerParams with a vmem limit sized from the real footprint (+headroom)."""
    total = int(sum(byte_terms) * 1.5) + (1 << 20)
    vmem = min(max(total, 32 << 20), 128 << 20)  # NOTE: v7x physical VMEM is 64 MiB.
    return pltpu.CompilerParams(dimension_semantics=sem, vmem_limit_bytes=vmem)


def _bn_affine(s_sum, s_sq, gamma, beta, batch):
    """Train-mode BatchNorm1d (biased batch stats) folded into per-channel affine,
    computed from one-pass sum / sum-of-squares (f32)."""
    inv_b = 1.0 / batch
    mean = s_sum * inv_b
    var = jnp.maximum(s_sq * inv_b - mean * mean, 0.0)
    scale = gamma * jax.lax.rsqrt(var + BN_EPS)
    shift = beta - mean * scale
    return scale, shift


def _mx(a, w):
    """MXU matmul with f32 accumulation; cast activations to the weight dtype
    (weights may already be bf16 from pack time)."""
    if w.dtype != jnp.float32:
        a = a.astype(w.dtype)
    return jnp.dot(a, w, preferred_element_type=jnp.float32)


# ----------------------------------------------------------------------------
# Fused single-block kernel (small launches: whole batch resident in VMEM).
# ----------------------------------------------------------------------------
def _fused_kernel(x_ref, w_ref, v_ref, out_ref, *, batch):
    x = x_ref[...]                       # (B, Cp) f32
    w1 = w_ref[0]                        # (Cp, Cp) already (in, out) -> no .T
    w2 = w_ref[1]
    v = v_ref[...]                       # (8, Cp): g1, be1, g2, be2, 0...
    g1, be1, g2, be2 = v[0:1], v[1:2], v[2:3], v[3:4]

    # fc1: Linear (bias dropped: cancels under train-mode BN) -> BN -> ReLU
    y1 = _mx(x, w1)
    sc1, sh1 = _bn_affine(jnp.sum(y1, axis=0, keepdims=True),
                          jnp.sum(y1 * y1, axis=0, keepdims=True), g1, be1, batch)
    h = jnp.maximum(y1 * sc1 + sh1, 0.0)

    # fc2: Linear -> BN (no activation)
    y2 = _mx(h, w2)
    sc2, sh2 = _bn_affine(jnp.sum(y2, axis=0, keepdims=True),
                          jnp.sum(y2 * y2, axis=0, keepdims=True), g2, be2, batch)

    out_ref[...] = jnp.maximum(y2 * sc2 + sh2 + x, 0.0)


def _run_fused(xp, w, vecs, batch):
    B, Cp = xp.shape
    full = lambda shape: pl.BlockSpec(shape, lambda: (0,) * len(shape))
    wbytes = w.size * w.dtype.itemsize
    cp = _compiler_params(None, wbytes, 7 * B * Cp * 4, vecs.size * 4)
    return pl.pallas_call(
        functools.partial(_fused_kernel, batch=batch),
        out_shape=jax.ShapeDtypeStruct((B, Cp), jnp.float32),
        grid=(),
        in_specs=[full((B, Cp)), full((2, Cp, Cp)), full((8, Cp))],
        out_specs=full((B, Cp)),
        compiler_params=cp,
    )(xp, w, vecs)


# ----------------------------------------------------------------------------
# Batch-tiled path: 3 pallas_calls with grid over B tiles and a persistent
# (2, Cp) sum/sumsq accumulator output per BN layer.
# ----------------------------------------------------------------------------
def _p1_matmul_stats_kernel(x_ref, w_ref, y1_ref, s1_ref):
    y1 = _mx(x_ref[...], w_ref[0])
    y1_ref[...] = y1

    @pl.when(pl.program_id(0) == 0)
    def _():
        s1_ref[...] = jnp.zeros_like(s1_ref)

    s1_ref[...] += jnp.concatenate(
        [jnp.sum(y1, axis=0, keepdims=True),
         jnp.sum(y1 * y1, axis=0, keepdims=True)], axis=0)


def _p2_bn_relu_matmul_stats_kernel(y1_ref, w_ref, v_ref, s1_ref, y2_ref, s2_ref, *, batch):
    v = v_ref[...]
    s1 = s1_ref[...]
    sc1, sh1 = _bn_affine(s1[0:1], s1[1:2], v[0:1], v[1:2], batch)
    h = jnp.maximum(y1_ref[...] * sc1 + sh1, 0.0)

    y2 = _mx(h, w_ref[0])
    y2_ref[...] = y2

    @pl.when(pl.program_id(0) == 0)
    def _():
        s2_ref[...] = jnp.zeros_like(s2_ref)

    s2_ref[...] += jnp.concatenate(
        [jnp.sum(y2, axis=0, keepdims=True),
         jnp.sum(y2 * y2, axis=0, keepdims=True)], axis=0)


def _p3_bn_residual_kernel(y2_ref, x_ref, v_ref, s2_ref, out_ref, *, batch):
    v = v_ref[...]
    s2 = s2_ref[...]
    sc2, sh2 = _bn_affine(s2[0:1], s2[1:2], v[2:3], v[3:4], batch)
    out_ref[...] = jnp.maximum(y2_ref[...] * sc2 + sh2 + x_ref[...], 0.0)


def _run_tiled(xp, w, vecs, tb, batch):
    B, Cp = xp.shape
    n = B // tb
    wbytes = Cp * Cp * w.dtype.itemsize           # one layer's weights
    tile_bytes = tb * Cp * 4
    cp_red = _compiler_params(("arbitrary",), 2 * wbytes, 6 * tile_bytes, 16 * Cp * 4)
    cp_par = _compiler_params(("parallel",), 8 * tile_bytes, 16 * Cp * 4)

    row_spec = pl.BlockSpec((tb, Cp), lambda i: (i, 0))
    stats_spec = pl.BlockSpec((2, Cp), lambda i: (0, 0))
    vec_spec = pl.BlockSpec((8, Cp), lambda i: (0, 0))

    # Phase 1: y1 = x @ W1 ; accumulate sum/sumsq for BN1.
    y1, s1 = pl.pallas_call(
        _p1_matmul_stats_kernel,
        out_shape=(jax.ShapeDtypeStruct((B, Cp), jnp.float32),
                   jax.ShapeDtypeStruct((2, Cp), jnp.float32)),
        grid=(n,),
        in_specs=[row_spec, pl.BlockSpec((1, Cp, Cp), lambda i: (0, 0, 0))],
        out_specs=(row_spec, stats_spec),
        compiler_params=cp_red,
    )(xp, w)

    # Phase 2: h = ReLU(BN1(y1)) ; y2 = h @ W2 ; accumulate sum/sumsq for BN2.
    y2, s2 = pl.pallas_call(
        functools.partial(_p2_bn_relu_matmul_stats_kernel, batch=batch),
        out_shape=(jax.ShapeDtypeStruct((B, Cp), jnp.float32),
                   jax.ShapeDtypeStruct((2, Cp), jnp.float32)),
        grid=(n,),
        in_specs=[row_spec, pl.BlockSpec((1, Cp, Cp), lambda i: (1, 0, 0)),
                  vec_spec, stats_spec],
        out_specs=(row_spec, stats_spec),
        compiler_params=cp_red,
    )(y1, w, vecs, s1)

    # Phase 3: out = ReLU(BN2(y2) + x)   (fully parallel over batch tiles).
    out = pl.pallas_call(
        functools.partial(_p3_bn_residual_kernel, batch=batch),
        out_shape=jax.ShapeDtypeStruct((B, Cp), jnp.float32),
        grid=(n,),
        in_specs=[row_spec, row_spec, vec_spec, stats_spec],
        out_specs=row_spec,
        compiler_params=cp_par,
    )(y2, xp, vecs, s2)
    return out


# ----------------------------------------------------------------------------
# Host-side packing and dispatch.
# ----------------------------------------------------------------------------
def pack_params(params, C, *, weight_dtype=jnp.float32):
    """One-time host-side prep: transpose weights to (in, out), zero-pad features
    to a lane multiple, pack into two slabs.  Linear biases are intentionally
    NOT packed: they cancel exactly under train-mode BatchNorm.  Pass
    weight_dtype=jnp.bfloat16 for the bf16 MXU path (f32 accumulation kept)."""
    Cp = _round_up(C, LANE)

    def pad_mat(w_t):                                        # (C, C) -> (Cp, Cp)
        m = jnp.pad(jnp.asarray(w_t, jnp.float32), ((0, Cp - C), (0, Cp - C)))
        return m.astype(weight_dtype)

    w = jnp.stack([pad_mat(jnp.asarray(params["w1"]).T),
                   pad_mat(jnp.asarray(params["w2"]).T)], axis=0)   # (2, Cp, Cp)

    def pad_vec(vec):
        return jnp.pad(jnp.asarray(vec, jnp.float32).reshape(-1), (0, Cp - C))

    zero = jnp.zeros((Cp,), jnp.float32)
    vecs = jnp.stack([pad_vec(params["g1"]), pad_vec(params["be1"]),
                      pad_vec(params["g2"]), pad_vec(params["be2"]),
                      zero, zero, zero, zero], axis=0)               # (8, Cp) f32
    return w, vecs


def _pick_batch_tile(B, max_tile):
    if B < 8 or B % 8 != 0:
        return None
    for cand in range(min(B, max_tile), 7, -8):
        if B % cand == 0:
            return cand
    return None


def res_fc_block_packed(x, w, vecs, *, batch_tile=512, force=None):
    """x: (B, C); w: (2, Cp, Cp) pre-transposed/padded (f32 or bf16); vecs: (8, Cp).
    force: None (auto) | 'fused' | 'tiled'."""
    B, C = x.shape
    Cp = w.shape[-1]
    xp = x.astype(jnp.float32)
    if Cp != C:
        xp = jnp.pad(xp, ((0, 0), (0, Cp - C)))

    fused_bytes = 2 * Cp * Cp * w.dtype.itemsize + 7 * B * Cp * 4
    tb = _pick_batch_tile(B, batch_tile)
    use_tiled = (force == "tiled") or (force is None and tb is not None
                                       and fused_bytes > (24 << 20))
    if use_tiled:
        if tb is None:
            raise ValueError("tiled path requires batch size divisible by 8")
        out = _run_tiled(xp, w, vecs, tb, B)
    else:
        out = _run_fused(xp, w, vecs, B)
    return out if Cp == C else out[:, :C]


def res_fc_block(x, params, *, weight_dtype=jnp.float32, **kw):
    w, vecs = pack_params(params, x.shape[1], weight_dtype=weight_dtype)
    return res_fc_block_packed(x, w, vecs, **kw)


# ----------------------------------------------------------------------------
# Reference + demo.
# ----------------------------------------------------------------------------
def init_params(key, C):
    """Deterministic synthetic parameters matching ResFCBlock(in_channels=C) shapes."""
    k1, k2, k3, k4 = jax.random.split(key, 4)
    bound = 1.0 / jnp.sqrt(C)
    return {
        "w1": jax.random.uniform(k1, (C, C), jnp.float32, -bound, bound),
        "b1": jax.random.uniform(k2, (1, C), jnp.float32, -bound, bound),
        "g1": jnp.ones((1, C), jnp.float32),
        "be1": jnp.zeros((1, C), jnp.float32),
        "w2": jax.random.uniform(k3, (C, C), jnp.float32, -bound, bound),
        "b2": jax.random.uniform(k4, (1, C), jnp.float32, -bound, bound),
        "g2": jnp.ones((1, C), jnp.float32),
        "be2": jnp.zeros((1, C), jnp.float32),
    }


def res_fc_block_ref(x, p):
    """Pure-JAX reference of the same forward pass (PyTorch form, incl. biases)."""
    def bn(y, g, b):
        m = y.mean(0, keepdims=True)
        v = ((y - m) ** 2).mean(0, keepdims=True)
        return (y - m) / jnp.sqrt(v + BN_EPS) * g + b
    h = jnp.maximum(bn(x @ p["w1"].T + p["b1"], p["g1"], p["be1"]), 0.0)
    y = bn(h @ p["w2"].T + p["b2"], p["g2"], p["be2"])
    return jnp.maximum(y + x, 0.0)


if __name__ == "__main__":
    key = jax.random.PRNGKey(0)
    kx, kp, kx2 = jax.random.split(key, 3)

    # Small fused-path check (B=8, C=32 -> Cp=128).
    B, C = 8, 32
    x = jax.random.normal(kx, (B, C), jnp.float32)
    params = init_params(kp, C)
    w_f32, vecs = pack_params(params, C)

    out = jax.block_until_ready(res_fc_block_packed(x, w_f32, vecs))
    ref = res_fc_block_ref(x, params)
    assert out.shape == (B, C)
    assert jnp.allclose(out, ref, atol=1e-4, rtol=1e-4), \
        float(jnp.max(jnp.abs(out - ref)))

    # Batch-tiled path check (grid over B tiles, sum/sumsq BN accumulators).
    B2 = 64
    x2 = jax.random.normal(kx2, (B2, C), jnp.float32)
    out2 = jax.block_until_ready(
        res_fc_block_packed(x2, w_f32, vecs, batch_tile=16, force="tiled"))
    ref2 = res_fc_block_ref(x2, params)
    assert out2.shape == (B2, C)
    assert jnp.allclose(out2, ref2, atol=1e-4, rtol=1e-4), \
        float(jnp.max(jnp.abs(out2 - ref2)))

    # bf16-weight MXU path (weights cast once at pack time, f32 accumulation).
    w_bf16, _ = pack_params(params, C, weight_dtype=jnp.bfloat16)
    out3 = jax.block_until_ready(
        res_fc_block_packed(x2, w_bf16, vecs, batch_tile=16, force="tiled"))
    assert out3.shape == (B2, C)
    assert bool(jnp.all(jnp.isfinite(out3)))
    assert float(jnp.max(jnp.abs(out3 - ref2))) < 1e-1

    print("KERNEL_OK")
</pallas_src>

<mosaic_0001>
module attributes {stable_mosaic.version = 11 : i64} {
  func.func @_fused_kernel(%arg0: memref<8x128xf32, #tpu.memory_space<vmem>>, %arg1: memref<2x128x128xf32, #tpu.memory_space<vmem>>, %arg2: memref<8x128xf32, #tpu.memory_space<vmem>>, %arg3: memref<8x128xf32, #tpu.memory_space<vmem>>) attributes {dimension_semantics = [], scalar_prefetch = 0 : i64, scratch_operands = 0 : i64, tpu.core_type = #tpu.core_type<tc>} {
    %c0 = arith.constant 0 : index
    %c0_0 = arith.constant 0 : index
    %0 = vector.load %arg0[%c0, %c0_0] : memref<8x128xf32, #tpu.memory_space<vmem>>, vector<8x128xf32>
    %c0_1 = arith.constant 0 : index
    %c0_2 = arith.constant 0 : index
    %c0_3 = arith.constant 0 : index
    %1 = vector.load %arg1[%c0_1, %c0_2, %c0_3] : memref<2x128x128xf32, #tpu.memory_space<vmem>>, vector<1x128x128xf32>
    %2 = vector.shape_cast %1 : vector<1x128x128xf32> to vector<128x128xf32>
    %c1 = arith.constant 1 : index
    %c0_4 = arith.constant 0 : index
    %c0_5 = arith.constant 0 : index
    %3 = vector.load %arg1[%c1, %c0_4, %c0_5] : memref<2x128x128xf32, #tpu.memory_space<vmem>>, vector<1x128x128xf32>
    %4 = vector.shape_cast %3 : vector<1x128x128xf32> to vector<128x128xf32>
    %c0_6 = arith.constant 0 : index
    %c0_7 = arith.constant 0 : index
    %5 = vector.load %arg2[%c0_6, %c0_7] : memref<8x128xf32, #tpu.memory_space<vmem>>, vector<8x128xf32>
    %6 = vector.extract_strided_slice %5 {offsets = [0, 0], sizes = [1, 128], strides = [1, 1]} : vector<8x128xf32> to vector<1x128xf32>
    %7 = vector.extract_strided_slice %5 {offsets = [1, 0], sizes = [1, 128], strides = [1, 1]} : vector<8x128xf32> to vector<1x128xf32>
    %8 = vector.extract_strided_slice %5 {offsets = [2, 0], sizes = [1, 128], strides = [1, 1]} : vector<8x128xf32> to vector<1x128xf32>
    %9 = vector.extract_strided_slice %5 {offsets = [3, 0], sizes = [1, 128], strides = [1, 1]} : vector<8x128xf32> to vector<1x128xf32>
    %cst = arith.constant dense<0.000000e+00> : vector<8x128xf32>
    %10 = tpu.matmul %0, %2, %cst {dimension_numbers = #tpu.dot_dimension_numbers<[1], [0], [0], [1], [0, 0, 1, 1], [], []>} : vector<8x128xf32>, vector<128x128xf32>, vector<8x128xf32> -> vector<8x128xf32>
    %cst_8 = arith.constant dense<0.000000e+00> : vector<128xf32>
    %11 = vector.multi_reduction <add>, %10, %cst_8 [0] : vector<8x128xf32> to vector<128xf32>
    %12 = vector.shape_cast %11 : vector<128xf32> to vector<1x128xf32>
    %13 = arith.mulf %10, %10 : vector<8x128xf32>
    %cst_9 = arith.constant dense<0.000000e+00> : vector<128xf32>
    %14 = vector.multi_reduction <add>, %13, %cst_9 [0] : vector<8x128xf32> to vector<128xf32>
    %15 = vector.shape_cast %14 : vector<128xf32> to vector<1x128xf32>
    %cst_10 = arith.constant 1.250000e-01 : f32
    %16 = vector.broadcast %cst_10 : f32 to vector<1x128xf32>
    %17 = arith.mulf %12, %16 : vector<1x128xf32>
    %cst_11 = arith.constant 1.250000e-01 : f32
    %18 = vector.broadcast %cst_11 : f32 to vector<1x128xf32>
    %19 = arith.mulf %15, %18 : vector<1x128xf32>
    %20 = arith.mulf %17, %17 : vector<1x128xf32>
    %21 = arith.subf %19, %20 : vector<1x128xf32>
    %cst_12 = arith.constant 0.000000e+00 : f32
    %22 = vector.broadcast %cst_12 : f32 to vector<1x128xf32>
    %23 = arith.maximumf %21, %22 : vector<1x128xf32>
    %cst_13 = arith.constant 9.99999974E-6 : f32
    %24 = vector.broadcast %cst_13 : f32 to vector<1x128xf32>
    %25 = arith.addf %23, %24 : vector<1x128xf32>
    %26 = math.rsqrt %25 : vector<1x128xf32>
    %27 = arith.mulf %6, %26 : vector<1x128xf32>
    %28 = arith.mulf %17, %27 : vector<1x128xf32>
    %29 = arith.subf %7, %28 : vector<1x128xf32>
    %30 = vector.broadcast %27 : vector<1x128xf32> to vector<8x128xf32>
    %31 = arith.mulf %10, %30 : vector<8x128xf32>
    %32 = vector.broadcast %29 : vector<1x128xf32> to vector<8x128xf32>
    %33 = arith.addf %31, %32 : vector<8x128xf32>
    %cst_14 = arith.constant 0.000000e+00 : f32
    %34 = vector.broadcast %cst_14 : f32 to vector<8x128xf32>
    %35 = arith.maximumf %33, %34 : vector<8x128xf32>
    %cst_15 = arith.constant dense<0.000000e+00> : vector<8x128xf32>
    %36 = tpu.matmul %35, %4, %cst_15 {dimension_numbers = #tpu.dot_dimension_numbers<[1], [0], [0], [1], [0, 0, 1, 1], [], []>} : vector<8x128xf32>, vector<128x128xf32>, vector<8x128xf32> -> vector<8x128xf32>
    %cst_16 = arith.constant dense<0.000000e+00> : vector<128xf32>
    %37 = vector.multi_reduction <add>, %36, %cst_16 [0] : vector<8x128xf32> to vector<128xf32>
    %38 = vector.shape_cast %37 : vector<128xf32> to vector<1x128xf32>
    %39 = arith.mulf %36, %36 : vector<8x128xf32>
    %cst_17 = arith.constant dense<0.000000e+00> : vector<128xf32>
    %40 = vector.multi_reduction <add>, %39, %cst_17 [0] : vector<8x128xf32> to vector<128xf32>
    %41 = vector.shape_cast %40 : vector<128xf32> to vector<1x128xf32>
    %cst_18 = arith.constant 1.250000e-01 : f32
    %42 = vector.broadcast %cst_18 : f32 to vector<1x128xf32>
    %43 = arith.mulf %38, %42 : vector<1x128xf32>
    %cst_19 = arith.constant 1.250000e-01 : f32
    %44 = vector.broadcast %cst_19 : f32 to vector<1x128xf32>
    %45 = arith.mulf %41, %44 : vector<1x128xf32>
    %46 = arith.mulf %43, %43 : vector<1x128xf32>
    %47 = arith.subf %45, %46 : vector<1x128xf32>
    %cst_20 = arith.constant 0.000000e+00 : f32
    %48 = vector.broadcast %cst_20 : f32 to vector<1x128xf32>
    %49 = arith.maximumf %47, %48 : vector<1x128xf32>
    %cst_21 = arith.constant 9.99999974E-6 : f32
    %50 = vector.broadcast %cst_21 : f32 to vector<1x128xf32>
    %51 = arith.addf %49, %50 : vector<1x128xf32>
    %52 = math.rsqrt %51 : vector<1x128xf32>
    %53 = arith.mulf %8, %52 : vector<1x128xf32>
    %54 = arith.mulf %43, %53 : vector<1x128xf32>
    %55 = arith.subf %9, %54 : vector<1x128xf32>
    %56 = vector.broadcast %53 : vector<1x128xf32> to vector<8x128xf32>
    %57 = arith.mulf %36, %56 : vector<8x128xf32>
    %58 = vector.broadcast %55 : vector<1x128xf32> to vector<8x128xf32>
    %59 = arith.addf %57, %58 : vector<8x128xf32>
    %60 = arith.addf %59, %0 : vector<8x128xf32>
    %cst_22 = arith.constant 0.000000e+00 : f32
    %61 = vector.broadcast %cst_22 : f32 to vector<8x128xf32>
    %62 = arith.maximumf %60, %61 : vector<8x128xf32>
    %c0_23 = arith.constant 0 : index
    %c0_24 = arith.constant 0 : index
    %63 = vector.load %arg3[%c0_23, %c0_24] : memref<8x128xf32, #tpu.memory_space<vmem>>, vector<8x128xf32>
    tpu.vector_store %arg3[%c0_23, %c0_24], %62 {strides = array<i32>} : memref<8x128xf32, #tpu.memory_space<vmem>>, vector<8x128xf32>,
    return
  }
}

</mosaic_0001>

<bundles_post_ra>
// kernel: tpu_custom_call.1
= control target key start
LH: loop header
LB: loop body
LE: loop exit
PB: predicated region body
PF: predicated region fallthrough
CT: control target
= control target key end

     0   :  { %8 = vsyncpa [#allocation3], 0  ;;  %s675_s0 = inlined_call_operand.hbm [shape: f32[8,128], index: 0, kind: input, shape index: {}]   ;;  %s676_s1 = inlined_call_operand.hbm [shape: f32[2,128,128], index: 1, kind: input, shape index: {}]   ;;  %s677_s2 = inlined_call_operand.hbm [shape: f32[8,128], index: 2, kind: input, shape index: {}]   ;;  %s678_s3 = inlined_call_operand.hbm [shape: f32[8,128], index: 3, kind: output, shape index: {}]  }
   0x1   :  { %9 = vsyncpa [#allocation6], 0 }
   0x2   :  { %10 = vsyncpa [#allocation4], 0  ;;  %s578_s12 = smov [#allocation5]   ;;  %s484_s16 = scalar_lea.hbm %s676_s1, 4096 }
   0x3   :  { %s26_s13 = sshll.u32 %s578_s12, 4  ;;  %p485_p0 = scmp.ne.s32.totalorder %s676_s1, %s484_s16  ;;  %s27_s13 = int_to_ptr.vmem [resolvable:$true] %s26_s13 }
   0x4   :  { %p488_p1 = scmp.lt.u32.totalorder %s484_s16, %s676_s1 }
   0x6   :  { %p490_p2 = pnand %p488_p1, %p485_p0 }
   0x8   :  { %493 = shalt.err (!%p490_p2)
}
   0x9   :  { %s494_s21 = scalar_lea.vmem %s27_s13, 4096  ;;  %p499_p4 = scmp.lt.s32.totalorder %s27_s13, %s27_s13 }
   0xa   :  { %p495_p3 = scmp.ne.s32.totalorder %s27_s13, %s494_s21  ;;  %p500_p5 = scmp.lt.s32.totalorder %s494_s21, %s494_s21 }
   0xc   :  { %p501_p6 = por %p500_p5, %p499_p4 }
   0xe   :  { %p502_p7 = pnand %p501_p6, %p495_p3 }
  0x10   :  { %505 = shalt.err (!%p502_p7)
}
  0x11   :  { %s579_s22 = smov 128   ;;  %s580_s23 = smov 8  }
  0x12   :  { %32 = dma.hbm_to_vmem [thread:$0]  %s676_s1, 4096, %s27_s13, [#allocation6], %s579_s22, %s579_s22, %s580_s23  }
  0x13   :  { %s581_s26 = smov [#allocation2]   ;;  %s582_s28 = smov [#allocation7]  }
  0x14   :  { %s17_s27 = sshll.u32 %s581_s26, 4  ;;  %s39_s29 = sshll.u32 %s582_s28, 4  ;;  %s18_s27 = int_to_ptr.vmem [resolvable:$true] %s17_s27  ;;  %s40_s29 = int_to_ptr.vmem [resolvable:$true] %s39_s29 }
  0x15   :  { %s506_s5 = scalar_lea.hbm %s675_s0, 128 }
  0x16   :  { %p507_p8 = scmp.ne.s32.totalorder %s675_s0, %s506_s5  ;;  %p510_p9 = scmp.lt.u32.totalorder %s506_s5, %s675_s0 }
  0x18   :  { %p512_p10 = pnand %p510_p9, %p507_p8 }
  0x1a   :  { %515 = shalt.err (!%p512_p10)
}
  0x1b   :  { %s516_s1 = scalar_lea.vmem %s18_s27, 128  ;;  %p521_p12 = scmp.lt.s32.totalorder %s18_s27, %s18_s27 }
  0x1c   :  { %p517_p11 = scmp.ne.s32.totalorder %s18_s27, %s516_s1  ;;  %p522_p13 = scmp.lt.s32.totalorder %s516_s1, %s516_s1 }
  0x1e   :  { %p523_p0 = por %p522_p13, %p521_p12 }
  0x20   :  { %p524_p1 = pnand %p523_p0, %p517_p11 }
  0x22   :  { %527 = shalt.err (!%p524_p1)
}
  0x23   :  { %20 = dma.hbm_to_vmem [thread:$0]  %s675_s0, 128, %s18_s27, [#allocation3]  }
  0x24   :  { %s528_s14 = scalar_lea.hbm %s677_s2, 128 }
  0x25   :  { %p529_p2 = scmp.ne.s32.totalorder %s677_s2, %s528_s14  ;;  %p532_p3 = scmp.lt.u32.totalorder %s528_s14, %s677_s2 }
  0x27   :  { %p534_p4 = pnand %p532_p3, %p529_p2 }
  0x29   :  { %537 = shalt.err (!%p534_p4)
}
  0x2a   :  { %s538_s19 = scalar_lea.vmem %s40_s29, 128  ;;  %p543_p6 = scmp.lt.s32.totalorder %s40_s29, %s40_s29 }
  0x2b   :  { %p539_p5 = scmp.ne.s32.totalorder %s40_s29, %s538_s19  ;;  %p544_p7 = scmp.lt.s32.totalorder %s538_s19, %s538_s19 }
  0x2d   :  { %p545_p8 = por %p544_p7, %p543_p6 }
  0x2f   :  { %p546_p9 = pnand %p545_p8, %p539_p5 }
  0x31   :  { %549 = shalt.err (!%p546_p9)
}
  0x32   :  { %42 = dma.hbm_to_vmem [thread:$0]  %s677_s2, 128, %s40_s29, [#allocation6]  }
  0x33   :  { %572 = dma.done.wait [#allocation3], 128  }
  0x34   :  { %573 = vsyncadd [#allocation3], 4294967168 }
  0x35   :  { %574 = dma.done.wait [#allocation6], 4224  }
  0x36   :  { %575 = vsyncadd [#allocation6], 4294963072  ;;  %v583_v0 = vmov 0.0|0.0   ;;  %vm584_vm0 = vmmov 0   ;;  %v585_v1 = vmov 0.0   ;;  %v53_v2 = vld [vmem:[#allocation5] sm:$0xff] }
  0x37   :  { %423 = vmatprep.subr.bf16.mxu0 %v583_v0  ;;  %385 = vmatprep.mubr.msk.f32.mxu0 %vm584_vm0, %v585_v1  ;;  %v54_v3 = vld [vmem:[#allocation5 + $0x8] sm:$0xff]  ;;  %v55_v4 = vld [vmem:[#allocation5 + $0x10] sm:$0xff]  ;;  %v56_v6 = vld [vmem:[#allocation5 + $0x18] sm:$0xff]  ;;  %s586_s2 = smov [#allocation8]  }
  0x38   :  { %447 = vmatprep.subr.bf16.mxu1 %v583_v0  ;;  %420 = vmatprep.mubr.msk.f32.mxu1 %vm584_vm0, %v585_v1  ;;  %v424_v5 = vpack.c.bf16 %v54_v3, %v53_v2  ;;  %v427_v7 = vpack.c.bf16 %v56_v6, %v55_v4  ;;  %v57_v8 = vld [vmem:[#allocation5 + $0x20] sm:$0xff]  ;;  %v58_v9 = vld [vmem:[#allocation5 + $0x28] sm:$0xff]  ;;  %v59_v11 = vld [vmem:[#allocation5 + $0x30] sm:$0xff]  ;;  %s309_s21 = sshll.u32 %s586_s2, 4  ;;  %s310_s21 = int_to_ptr.vmem [resolvable:$true] %s309_s21 }
  0x39   :  { %v430_v10 = vpack.c.bf16 %v58_v9, %v57_v8  ;;  %v60_v12 = vld [vmem:[#allocation5 + $0x38] sm:$0xff]  ;;  %v61_v14 = vld [vmem:[#allocation5 + $0x40] sm:$0xff]  ;;  %v62_v15 = vld [vmem:[#allocation5 + $0x48] sm:$0xff]  ;;  %v183_v8 = vlaneseq  ;;  %s550_s22 = scalar_lea.vmem %s310_s21, 128  ;;  %p555_p11 = scmp.lt.s32.totalorder %s310_s21, %s310_s21 }
  0x3a   :  { %425 = vmatpush3.bf16.msra.mxu0 %v424_v5  ;;  %v433_v13 = vpack.c.bf16 %v60_v12, %v59_v11  ;;  %v436_v16 = vpack.c.bf16 %v62_v15, %v61_v14  ;;  %v63_v17 = vld [vmem:[#allocation5 + $0x50] sm:$0xff]  ;;  %v64_v18 = vld [vmem:[#allocation5 + $0x58] sm:$0xff]  ;;  %v65_v20 = vld [vmem:[#allocation5 + $0x60] sm:$0xff]  ;;  %p551_p10 = scmp.ne.s32.totalorder %s310_s21, %s550_s22  ;;  %p556_p12 = scmp.lt.s32.totalorder %s550_s22, %s550_s22 }
  0x3b   :  { %426 = vmatprep.subr.bf16.mxu0 %v583_v0  ;;  %v439_v19 = vpack.c.bf16 %v64_v18, %v63_v17  ;;  %v66_v21 = vld [vmem:[#allocation5 + $0x68] sm:$0xff]  ;;  %v67_v23 = vld [vmem:[#allocation5 + $0x70] sm:$0xff]  ;;  %v68_v24 = vld [vmem:[#allocation5 + $0x78] sm:$0xff]  ;;  %v184_v9 = vshrl.u32 %v183_v8, 7 }
  0x3c   :  { %v442_v22 = vpack.c.bf16 %v66_v21, %v65_v20  ;;  %v445_v25 = vpack.c.bf16 %v68_v24, %v67_v23  ;;  %v652_v26 = vld [vmem:[#allocation2] sm:$0xff]  ;;  %v70_v27 = vld [vmem:[#allocation5 + $0x80] sm:$0xff]  ;;  %v71_v28 = vld [vmem:[#allocation5 + $0x88] sm:$0xff]  ;;  %p557_p13 = por %p556_p12, %p555_p11 }
  0x3d   :  { %v448_v29 = vpack.c.bf16 %v71_v28, %v70_v27  ;;  %v72_v30 = vld [vmem:[#allocation5 + $0x90] sm:$0xff]  ;;  %v73_v31 = vld [vmem:[#allocation5 + $0x98] sm:$0xff]  ;;  %v74_v33 = vld [vmem:[#allocation5 + $0xa0] sm:$0xff]  ;;  %v190_v17 = vsub.s32 1, %v184_v9 }
  0x3e   :  { %428 = vmatpush3.bf16.msra.mxu0 %v427_v7  ;;  %v451_v32 = vpack.c.bf16 %v73_v31, %v72_v30  ;;  %v75_v34 = vld [vmem:[#allocation5 + $0xa8] sm:$0xff]  ;;  %v76_v36 = vld [vmem:[#allocation5 + $0xb0] sm:$0xff]  ;;  %v77_v37 = vld [vmem:[#allocation5 + $0xb8] sm:$0xff]  ;;  %p558_p0 = pnand %p557_p13, %p551_p10 }
  0x3f   :  { %429 = vmatprep.subr.bf16.mxu0 %v583_v0  ;;  %449 = vmatpush3.bf16.msra.mxu1 %v448_v29  ;;  %v454_v35 = vpack.c.bf16 %v75_v34, %v74_v33  ;;  %v457_v38 = vpack.c.bf16 %v77_v37, %v76_v36  ;;  %v78_v39 = vld [vmem:[#allocation5 + $0xc0] sm:$0xff]  ;;  %v79_v40 = vld [vmem:[#allocation5 + $0xc8] sm:$0xff]  ;;  %v80_v42 = vld [vmem:[#allocation5 + $0xd0] sm:$0xff] }
  0x40   :  { %450 = vmatprep.subr.bf16.mxu1 %v583_v0  ;;  %v460_v41 = vpack.c.bf16 %v79_v40, %v78_v39  ;;  %v81_v43 = vld [vmem:[#allocation5 + $0xd8] sm:$0xff]  ;;  %v82_v45 = vld [vmem:[#allocation5 + $0xe0] sm:$0xff]  ;;  %v83_v46 = vld [vmem:[#allocation5 + $0xe8] sm:$0xff] }
  0x41   :  { %v463_v44 = vpack.c.bf16 %v81_v43, %v80_v42  ;;  %v84_v47 = vld [vmem:[#allocation5 + $0xf0] sm:$0xff]  ;;  %v466_v48 = vpack.c.bf16 %v83_v46, %v82_v45  ;;  %v85_v49 = vld [vmem:[#allocation5 + $0xf8] sm:$0xff] }
  0x42   :  { %431 = vmatpush3.bf16.msra.mxu0 %v430_v10  ;;  %v469_v50 = vpack.c.bf16 %v85_v49, %v84_v47  ;;  %v86_v10 = vld [vmem:[#allocation7] sm:$0xff]  ;;  %v292_v47 = vsub.s32 2, %v184_v9 }
  0x43   :  { %432 = vmatprep.subr.bf16.mxu0 %v583_v0  ;;  %452 = vmatpush3.bf16.msra.mxu1 %v451_v32 }
  0x44   :  { %453 = vmatprep.subr.bf16.mxu1 %v583_v0 }
  0x46   :  { %434 = vmatpush3.bf16.msra.mxu0 %v433_v13  ;;  %v185_v13 = vsub.s32 0, %v184_v9 }
  0x47   :  { %435 = vmatprep.subr.bf16.mxu0 %v583_v0  ;;  %455 = vmatpush3.bf16.msra.mxu1 %v454_v35 }
  0x48   :  { %456 = vmatprep.subr.bf16.mxu1 %v583_v0 }
  0x4a   :  { %437 = vmatpush3.bf16.msra.mxu0 %v436_v16 }
  0x4b   :  { %438 = vmatprep.subr.bf16.mxu0 %v583_v0  ;;  %458 = vmatpush3.bf16.msra.mxu1 %v457_v38 }
  0x4c   :  { %459 = vmatprep.subr.bf16.mxu1 %v583_v0 }
  0x4e   :  { %440 = vmatpush3.bf16.msra.mxu0 %v439_v19 }
  0x4f   :  { %441 = vmatprep.subr.bf16.mxu0 %v583_v0  ;;  %461 = vmatpush3.bf16.msra.mxu1 %v460_v41 }
  0x50   :  { %462 = vmatprep.subr.bf16.mxu1 %v583_v0 }
  0x52   :  { %443 = vmatpush3.bf16.msra.mxu0 %v442_v22 }
  0x53   :  { %444 = vmatprep.subr.bf16.mxu0 %v583_v0  ;;  %464 = vmatpush3.bf16.msra.mxu1 %v463_v44 }
  0x54   :  { %465 = vmatprep.subr.bf16.mxu1 %v583_v0 }
  0x56   :  { %446 = vmatpush3.bf16.msra.mxu0 %v445_v25 }
  0x57   :  { %467 = vmatpush3.bf16.msra.mxu1 %v466_v48 }
  0x58   :  { %468 = vmatprep.subr.bf16.mxu1 %v583_v0 }
  0x59   :  { %386 = vmatmul.mubr.f32.vlgmr.msra.gmra.mrb[0].mxu0 %v652_v26 }
  0x5b   :  { %470 = vmatpush3.bf16.msra.mxu1 %v469_v50 }
 0x12c   :  { %v153_v51 = vpop.f32.mrb[0].mxu0 }
 0x12d   :  { %v157_v52 = vrot.slane %v153_v51, 4  ;;  %v163_v53 = vmul.f32 %v153_v51, %v153_v51  ;;  %v387_v54 = vpop.f32.mrb[1].mxu0 }
 0x12f   :  { %v158_v55 = vadd.f32 %v157_v52, %v153_v51  ;;  %v164_v56 = vrot.slane %v163_v53, 4 }
 0x131   :  { %v159_v57 = vrot.slane %v158_v55, 2  ;;  %v165_v58 = vadd.f32 %v164_v56, %v163_v53 }
 0x133   :  { %v160_v59 = vadd.f32 %v159_v57, %v158_v55  ;;  %v166_v60 = vrot.slane %v165_v58, 2 }
 0x135   :  { %v161_v61 = vrot.slane %v160_v59, 1  ;;  %v167_v62 = vadd.f32 %v166_v60, %v165_v58 }
 0x137   :  { %v162_v63 = vadd.f32 %v161_v61, %v160_v59  ;;  %v168_v1 = vrot.slane %v167_v62, 1 }
 0x139   :  { %v169_v2 = vadd.f32 %v168_v1, %v167_v62  ;;  %v170_v3 = vmul.f32 0.125, %v162_v63 }
 0x13b   :  { %v171_v4 = vmul.f32 0.125, %v169_v2  ;;  %v172_v5 = vmul.f32 %v170_v3, %v170_v3 }
 0x13d   :  { %v173_v0 = vsub.f32 %v171_v4, %v172_v5 }
 0x13f   :  { %v174_v6 = vmax.f32 %v173_v0, 0.0 }
 0x141   :  { %v175_v7 = vadd.f32 1e-05, %v174_v6 }
 0x143   :  { %480 = vrsqrt.f32 %v175_v7 }
 0x14d   :  { %v481_v11 = vpop.eup %480 }
 0x14e   :  { %v177_v12 = vmul.f32 %v481_v11, %v86_v10 }
 0x150   :  { %v178_v14 = vmul.f32 %v177_v12, %v170_v3  ;;  %v186_v15 = vrot.slane %v177_v12, %v185_v13 }
 0x152   :  { %v180_v16 = vrot.slane %v178_v14, 7  ;;  %v187_v19 = vmul.f32 %v186_v15, %v153_v51  ;;  %v297_v51 = vsub.s32 3, %v184_v9 }
 0x154   :  { %v182_v18 = vsub.f32 %v86_v10, %v180_v16 }
 0x156   :  { %v191_v20 = vrot.slane %v182_v18, %v190_v17 }
 0x158   :  { %v192_v21 = vadd.f32 %v191_v20, %v187_v19 }
 0x15a   :  { %v193_v22 = vmax.f32 %v192_v21, 0.0 }
 0x15c   :  { %421 = vmatmul.mubr.f32.vlgmr.msra.gmra.mrb[0].mxu1 %v193_v22 }
 0x22f   :  { %v260_v23 = vpop.f32.mrb[0].mxu1 }
 0x230   :  { %v264_v24 = vrot.slane %v260_v23, 4  ;;  %v270_v25 = vmul.f32 %v260_v23, %v260_v23  ;;  %v422_v27 = vpop.f32.mrb[1].mxu1 }
 0x232   :  { %v265_v28 = vadd.f32 %v264_v24, %v260_v23  ;;  %v271_v29 = vrot.slane %v270_v25, 4 }
 0x234   :  { %v266_v30 = vrot.slane %v265_v28, 2  ;;  %v272_v31 = vadd.f32 %v271_v29, %v270_v25 }
 0x236   :  { %v267_v32 = vadd.f32 %v266_v30, %v265_v28  ;;  %v273_v33 = vrot.slane %v272_v31, 2 }
 0x238   :  { %v268_v34 = vrot.slane %v267_v32, 1  ;;  %v274_v35 = vadd.f32 %v273_v33, %v272_v31 }
 0x23a   :  { %v269_v36 = vadd.f32 %v268_v34, %v267_v32  ;;  %v275_v37 = vrot.slane %v274_v35, 1 }
 0x23c   :  { %v276_v38 = vadd.f32 %v275_v37, %v274_v35  ;;  %v277_v39 = vmul.f32 0.125, %v269_v36 }
 0x23e   :  { %v278_v40 = vmul.f32 0.125, %v276_v38  ;;  %v279_v41 = vmul.f32 %v277_v39, %v277_v39 }
 0x240   :  { %v280_v42 = vsub.f32 %v278_v40, %v279_v41 }
 0x242   :  { %v281_v43 = vmax.f32 %v280_v42, 0.0 }
 0x244   :  { %v282_v44 = vadd.f32 1e-05, %v281_v43 }
 0x246   :  { %482 = vrsqrt.f32 %v282_v44 }
 0x250   :  { %v483_v45 = vpop.eup %482 }
 0x251   :  { %v284_v46 = vmul.f32 %v483_v45, %v86_v10 }
 0x253   :  { %v285_v48 = vmul.f32 %v284_v46, %v277_v39  ;;  %v293_v49 = vrot.slane %v284_v46, %v292_v47 }
 0x255   :  { %v287_v50 = vrot.slane %v285_v48, 7  ;;  %v294_v53 = vmul.f32 %v293_v49, %v260_v23 }
 0x257   :  { %v289_v52 = vsub.f32 %v86_v10, %v287_v50 }
 0x259   :  { %v298_v54 = vrot.slane %v289_v52, %v297_v51 }
 0x25b   :  { %v299_v55 = vadd.f32 %v298_v54, %v294_v53 }
 0x25d   :  { %v300_v56 = vadd.f32 %v299_v55, %v652_v26 }
 0x25f   :  { %v301_v57 = vmax.f32 %v300_v56, 0.0 }
 0x261   :  { %302 = vst [vmem:[#allocation8] sm:$0xff] %v301_v57 }
 0x262   :  { %561 = shalt.err (!%p558_p0)
}
 0x263   :  { %s562_s25 = scalar_lea.hbm %s678_s3, 128 }
 0x264   :  { %p563_p1 = scmp.ne.s32.totalorder %s678_s3, %s562_s25  ;;  %p566_p2 = scmp.lt.u32.totalorder %s562_s25, %s678_s3 }
 0x266   :  { %p568_p3 = pnand %p566_p2, %p563_p1 }
 0x268   :  { %571 = shalt.err (!%p568_p3)
}
 0x269   :  { %312 = dma.vmem_to_hbm [thread:$0]  %s310_s21, 128, %s678_s3, [#allocation4]  }
 0x26a   :  { %576 = dma.done.wait [#allocation4], 128  }
 0x26b   :  { %577 = vsyncadd [#allocation4], 4294967168 }
 0x26c   :  { %316 = vsyncpa [#allocation3], 1 }
 0x26d   :  { %317 = vsyncpa [#allocation6], 1 }
 0x26e   :  { %318 = vsyncpa [#allocation4], 1 }

</bundles_post_ra>
